<compile_context>
chip_gen: v7x
topology: tpu7x:2x2x1
jax: 0.10.0
libtpu: 0.0.40
codegen_flags: <defaults>
</compile_context>

<pallas_src>
import jax
import jax.numpy as jnp
from jax.experimental import pallas as pl
from jax.experimental.pallas import tpu as pltpu


def shape_calc(shape):
    res = 1
    for s in shape:
        res *= s
    return res


def _round_up(x, m):
    return ((x + m - 1) // m) * m


def decoder_kernel(
    x_ref,       # (TILE_B, E)     embedded_var tile
    w1_ref,      # (E, 2E)         net1[0]
    wA_ref,      # (2E, Cp)        fused branch layer 1 (net1[2] folded in)
    wB_ref,      # (Cp, Cp)        block-diag(net2[2], net3[2])
    wC_ref,      # (Cp, Cp)        block-diag(net2[4], net3[4])
    bias_ref,    # (8, PADW)       packed biases, one row per bias
    out_ref,     # (TILE_B, Cp)    [view | feature | zero-pad]
):
    E2 = w1_ref.shape[1]
    Cp = wA_ref.shape[1]

    b = bias_ref[...]                 # one 4 KiB slab -> a single vreg-sized load
    b1 = b[0:1, :E2]
    bA = b[1:2, :Cp]
    bB = b[2:3, :Cp]
    bC = b[3:4, :Cp]

    x = x_ref[...]

    # net1[0] + ReLU (net1[2] has no activation and is folded into wA).
    h = jnp.maximum(
        jnp.dot(x, w1_ref[...], preferred_element_type=jnp.float32) + b1, 0.0)

    # Fused view/feature branches (block-diagonal weights keep them independent).
    a = jnp.maximum(
        jnp.dot(h, wA_ref[...], preferred_element_type=jnp.float32) + bA, 0.0)
    a = jnp.maximum(
        jnp.dot(a, wB_ref[...], preferred_element_type=jnp.float32) + bB, 0.0)
    out_ref[...] = (
        jnp.dot(a, wC_ref[...], preferred_element_type=jnp.float32) + bC)


def decoder_forward(embedded_var, params, view_space, feature_space):
    """embedded_var: (B, embedded_size). Returns (recons_view, recons_feature)."""
    (w1a, b1a, w1b, b1b,
     w2a, b2a, w2b, b2b, w2c, b2c,
     w3a, b3a, w3b, b3b, w3c, b3c) = params

    B, E = embedded_var.shape
    E2 = w1a.shape[1]                 # 2E
    V = w2c.shape[1]
    Fd = w3c.shape[1]
    C = V + Fd
    Cp = _round_up(C, 128)            # 128-lane-aligned fused width

    f32 = jnp.float32

    # --- algebraic fold: net1[2] into branch-first layers (no activation between) ---
    w2a_f = w1b @ w2a                 # (2E, V)
    b2a_f = b1b @ w2a + b2a           # (1, V)
    w3a_f = w1b @ w3a                 # (2E, F)
    b3a_f = b1b @ w3a + b3a           # (1, F)

    # --- fuse the two branches into lane-dense, 128-padded operands ---
    wA = jnp.zeros((E2, Cp), f32).at[:, :V].set(w2a_f).at[:, V:C].set(w3a_f)
    wB = jnp.zeros((Cp, Cp), f32).at[:V, :V].set(w2b).at[V:C, V:C].set(w3b)
    wC = jnp.zeros((Cp, Cp), f32).at[:V, :V].set(w2c).at[V:C, V:C].set(w3c)

    # --- pack the 4 biases into one (8, PADW) slab -> one resident VMEM operand ---
    padw = _round_up(max(E2, Cp), 128)
    bias = jnp.zeros((8, padw), f32)
    bias = bias.at[0, :E2].set(b1a[0])
    bias = bias.at[1, :V].set(b2a_f[0]).at[1, V:C].set(b3a_f[0])
    bias = bias.at[2, :V].set(b2b[0]).at[2, V:C].set(b3b[0])
    bias = bias.at[3, :V].set(b2c[0]).at[3, V:C].set(b3c[0])

    # --- batch tiling: no wrapper pad, ragged last tile is fine ---------------
    x = embedded_var.astype(f32)
    if B <= 64:
        tile_b = _round_up(B, 8)                      # single step for tiny B
    else:
        # >= 2 grid steps (keeps both v7x TensorCores busy), <= 4096-row tiles.
        tile_b = min(4096, _round_up(pl.cdiv(B, 2), 8))
    grid = (pl.cdiv(B, tile_b),)

    def resident(arr):
        return pl.BlockSpec(arr.shape, lambda i: (0, 0))

    out = pl.pallas_call(
        decoder_kernel,
        out_shape=jax.ShapeDtypeStruct((B, Cp), f32),
        grid=grid,
        in_specs=[
            pl.BlockSpec((tile_b, E), lambda i: (i, 0)),
            resident(w1a),
            resident(wA),
            resident(wB),
            resident(wC),
            resident(bias),
        ],
        out_specs=pl.BlockSpec((tile_b, Cp), lambda i: (i, 0)),
        compiler_params=pltpu.CompilerParams(
            dimension_semantics=("parallel",)),
    )(x, w1a, wA, wB, wC, bias)

    recons_view = out[:, :V].reshape((B,) + tuple(view_space))
    recons_feature = out[:, V:C].reshape((B,) + tuple(feature_space))
    return recons_view, recons_feature


def init_params(key, view_space, feature_space, embedded_size):
    """PyTorch-style uniform(-1/sqrt(fan_in), 1/sqrt(fan_in)) init.

    Weights stored as (in_features, out_features) so the kernel does x @ W.
    Biases stored as (1, out_features).
    """
    v_space = shape_calc(view_space)
    f_space = shape_calc(feature_space)
    E = embedded_size

    def linear(k, fan_in, fan_out):
        kw, kb = jax.random.split(k)
        bound = 1.0 / jnp.sqrt(jnp.float32(fan_in))
        w = jax.random.uniform(kw, (fan_in, fan_out), jnp.float32, -bound, bound)
        b = jax.random.uniform(kb, (1, fan_out), jnp.float32, -bound, bound)
        return w, b

    k = jax.random.split(key, 8)
    w1a, b1a = linear(k[0], E, 2 * E)            # net1[0]
    w1b, b1b = linear(k[1], 2 * E, 4 * E)        # net1[2]
    w2a, b2a = linear(k[2], 4 * E, v_space)      # net2[0]
    w2b, b2b = linear(k[3], v_space, v_space)    # net2[2]
    w2c, b2c = linear(k[4], v_space, v_space)    # net2[4]
    w3a, b3a = linear(k[5], 4 * E, f_space)      # net3[0]
    w3b, b3b = linear(k[6], f_space, f_space)    # net3[2]
    w3c, b3c = linear(k[7], f_space, f_space)    # net3[4]
    return (w1a, b1a, w1b, b1b,
            w2a, b2a, w2b, b2b, w2c, b2c,
            w3a, b3a, w3b, b3b, w3c, b3c)


if __name__ == "__main__":
    key = jax.random.PRNGKey(0)

    B = 8
    view_space = (3, 4, 4)      # v_space = 48
    feature_space = (8,)        # f_space = 8
    action_space = (5,)         # unused by forward (kept only for signature parity)
    embedded_size = 16

    k_x, k_p = jax.random.split(key)
    embedded_var = jax.random.normal(k_x, (B, embedded_size), jnp.float32)
    params = init_params(k_p, view_space, feature_space, embedded_size)

    recons_view, recons_feature = decoder_forward(
        embedded_var, params, view_space, feature_space)
    jax.block_until_ready((recons_view, recons_feature))

    # Pure-JAX reference using the original (un-folded, un-fused) parameters.
    (w1a, b1a, w1b, b1b,
     w2a, b2a, w2b, b2b, w2c, b2c,
     w3a, b3a, w3b, b3b, w3c, b3c) = params
    h = jnp.maximum(embedded_var @ w1a + b1a, 0.0) @ w1b + b1b
    hv = jnp.maximum(h @ w2a + b2a, 0.0)
    hv = jnp.maximum(hv @ w2b + b2b, 0.0)
    hv = hv @ w2c + b2c
    hf = jnp.maximum(h @ w3a + b3a, 0.0)
    hf = jnp.maximum(hf @ w3b + b3b, 0.0)
    hf = hf @ w3c + b3c
    ref_view = hv.reshape((B,) + view_space)
    ref_feat = hf.reshape((B,) + feature_space)

    assert recons_view.shape == (B,) + view_space
    assert recons_feature.shape == (B,) + feature_space
    assert jnp.allclose(recons_view, ref_view, atol=1e-4, rtol=1e-4)
    assert jnp.allclose(recons_feature, ref_feat, atol=1e-4, rtol=1e-4)

    print("KERNEL_OK")
</pallas_src>

<mosaic_0001>
module attributes {stable_mosaic.version = 11 : i64} {
  func.func @decoder_kernel(%arg0: i32, %arg1: memref<8x16xf32, #tpu.memory_space<vmem>>, %arg2: memref<16x32xf32, #tpu.memory_space<vmem>>, %arg3: memref<32x128xf32, #tpu.memory_space<vmem>>, %arg4: memref<128x128xf32, #tpu.memory_space<vmem>>, %arg5: memref<128x128xf32, #tpu.memory_space<vmem>>, %arg6: memref<8x128xf32, #tpu.memory_space<vmem>>, %arg7: memref<8x128xf32, #tpu.memory_space<vmem>>) attributes {dimension_semantics = [#tpu.dimension_semantics<parallel>], iteration_bounds = array<i64: 1>, scalar_prefetch = 0 : i64, scratch_operands = 0 : i64, tpu.core_type = #tpu.core_type<tc>, window_params = [{transform_indices = @transform_0, window_bounds = array<i64: 8, 16>}, {pipeline_mode = #tpu.pipeline_mode<synchronous>, transform_indices = @transform_1, window_bounds = array<i64: 16, 32>}, {pipeline_mode = #tpu.pipeline_mode<synchronous>, transform_indices = @transform_2, window_bounds = array<i64: 32, 128>}, {pipeline_mode = #tpu.pipeline_mode<synchronous>, transform_indices = @transform_3, window_bounds = array<i64: 128, 128>}, {pipeline_mode = #tpu.pipeline_mode<synchronous>, transform_indices = @transform_4, window_bounds = array<i64: 128, 128>}, {pipeline_mode = #tpu.pipeline_mode<synchronous>, transform_indices = @transform_5, window_bounds = array<i64: 8, 128>}, {transform_indices = @transform_6, window_bounds = array<i64: 8, 128>}]} {
    %c0 = arith.constant 0 : index
    %c0_0 = arith.constant 0 : index
    %0 = vector.load %arg6[%c0, %c0_0] : memref<8x128xf32, #tpu.memory_space<vmem>>, vector<8x128xf32>
    %1 = vector.extract_strided_slice %0 {offsets = [0, 0], sizes = [1, 32], strides = [1, 1]} : vector<8x128xf32> to vector<1x32xf32>
    %2 = vector.extract_strided_slice %0 {offsets = [1, 0], sizes = [1, 128], strides = [1, 1]} : vector<8x128xf32> to vector<1x128xf32>
    %3 = vector.extract_strided_slice %0 {offsets = [2, 0], sizes = [1, 128], strides = [1, 1]} : vector<8x128xf32> to vector<1x128xf32>
    %4 = vector.extract_strided_slice %0 {offsets = [3, 0], sizes = [1, 128], strides = [1, 1]} : vector<8x128xf32> to vector<1x128xf32>
    %c0_1 = arith.constant 0 : index
    %c0_2 = arith.constant 0 : index
    %5 = vector.load %arg1[%c0_1, %c0_2] : memref<8x16xf32, #tpu.memory_space<vmem>>, vector<8x16xf32>
    %c0_3 = arith.constant 0 : index
    %c0_4 = arith.constant 0 : index
    %6 = vector.load %arg2[%c0_3, %c0_4] : memref<16x32xf32, #tpu.memory_space<vmem>>, vector<16x32xf32>
    %cst = arith.constant dense<0.000000e+00> : vector<8x32xf32>
    %7 = tpu.matmul %5, %6, %cst {dimension_numbers = #tpu.dot_dimension_numbers<[1], [0], [0], [1], [0, 0, 1, 1], [], []>} : vector<8x16xf32>, vector<16x32xf32>, vector<8x32xf32> -> vector<8x32xf32>
    %8 = vector.broadcast %1 : vector<1x32xf32> to vector<8x32xf32>
    %9 = arith.addf %7, %8 : vector<8x32xf32>
    %cst_5 = arith.constant 0.000000e+00 : f32
    %10 = vector.broadcast %cst_5 : f32 to vector<8x32xf32>
    %11 = arith.maximumf %9, %10 : vector<8x32xf32>
    %c0_6 = arith.constant 0 : index
    %c0_7 = arith.constant 0 : index
    %12 = vector.load %arg3[%c0_6, %c0_7] : memref<32x128xf32, #tpu.memory_space<vmem>>, vector<32x128xf32>
    %cst_8 = arith.constant dense<0.000000e+00> : vector<8x128xf32>
    %13 = tpu.matmul %11, %12, %cst_8 {dimension_numbers = #tpu.dot_dimension_numbers<[1], [0], [0], [1], [0, 0, 1, 1], [], []>} : vector<8x32xf32>, vector<32x128xf32>, vector<8x128xf32> -> vector<8x128xf32>
    %14 = vector.broadcast %2 : vector<1x128xf32> to vector<8x128xf32>
    %15 = arith.addf %13, %14 : vector<8x128xf32>
    %cst_9 = arith.constant 0.000000e+00 : f32
    %16 = vector.broadcast %cst_9 : f32 to vector<8x128xf32>
    %17 = arith.maximumf %15, %16 : vector<8x128xf32>
    %c0_10 = arith.constant 0 : index
    %c0_11 = arith.constant 0 : index
    %18 = vector.load %arg4[%c0_10, %c0_11] : memref<128x128xf32, #tpu.memory_space<vmem>>, vector<128x128xf32>
    %cst_12 = arith.constant dense<0.000000e+00> : vector<8x128xf32>
    %19 = tpu.matmul %17, %18, %cst_12 {dimension_numbers = #tpu.dot_dimension_numbers<[1], [0], [0], [1], [0, 0, 1, 1], [], []>} : vector<8x128xf32>, vector<128x128xf32>, vector<8x128xf32> -> vector<8x128xf32>
    %20 = vector.broadcast %3 : vector<1x128xf32> to vector<8x128xf32>
    %21 = arith.addf %19, %20 : vector<8x128xf32>
    %cst_13 = arith.constant 0.000000e+00 : f32
    %22 = vector.broadcast %cst_13 : f32 to vector<8x128xf32>
    %23 = arith.maximumf %21, %22 : vector<8x128xf32>
    %c0_14 = arith.constant 0 : index
    %c0_15 = arith.constant 0 : index
    %24 = vector.load %arg5[%c0_14, %c0_15] : memref<128x128xf32, #tpu.memory_space<vmem>>, vector<128x128xf32>
    %cst_16 = arith.constant dense<0.000000e+00> : vector<8x128xf32>
    %25 = tpu.matmul %23, %24, %cst_16 {dimension_numbers = #tpu.dot_dimension_numbers<[1], [0], [0], [1], [0, 0, 1, 1], [], []>} : vector<8x128xf32>, vector<128x128xf32>, vector<8x128xf32> -> vector<8x128xf32>
    %26 = vector.broadcast %4 : vector<1x128xf32> to vector<8x128xf32>
    %27 = arith.addf %25, %26 : vector<8x128xf32>
    %c0_17 = arith.constant 0 : index
    %c0_18 = arith.constant 0 : index
    %28 = vector.load %arg7[%c0_17, %c0_18] : memref<8x128xf32, #tpu.memory_space<vmem>>, vector<8x128xf32>
    tpu.vector_store %arg7[%c0_17, %c0_18], %27 {strides = array<i32>} : memref<8x128xf32, #tpu.memory_space<vmem>>, vector<8x128xf32>,
    return
  }
  func.func @transform_0(%arg0: i32) -> (i32, i32) {
    %c0_i32 = arith.constant 0 : i32
    %c0_i32_0 = arith.constant 0 : i32
    return %arg0, %c0_i32 : i32, i32
  }
  func.func @transform_1(%arg0: i32) -> (i32, i32) {
    %c0_i32 = arith.constant 0 : i32
    %c0_i32_0 = arith.constant 0 : i32
    %c0_i32_1 = arith.constant 0 : i32
    return %c0_i32, %c0_i32_0 : i32, i32
  }
  func.func @transform_2(%arg0: i32) -> (i32, i32) {
    %c0_i32 = arith.constant 0 : i32
    %c0_i32_0 = arith.constant 0 : i32
    %c0_i32_1 = arith.constant 0 : i32
    return %c0_i32, %c0_i32_0 : i32, i32
  }
  func.func @transform_3(%arg0: i32) -> (i32, i32) {
    %c0_i32 = arith.constant 0 : i32
    %c0_i32_0 = arith.constant 0 : i32
    %c0_i32_1 = arith.constant 0 : i32
    return %c0_i32, %c0_i32_0 : i32, i32
  }
  func.func @transform_4(%arg0: i32) -> (i32, i32) {
    %c0_i32 = arith.constant 0 : i32
    %c0_i32_0 = arith.constant 0 : i32
    %c0_i32_1 = arith.constant 0 : i32
    return %c0_i32, %c0_i32_0 : i32, i32
  }
  func.func @transform_5(%arg0: i32) -> (i32, i32) {
    %c0_i32 = arith.constant 0 : i32
    %c0_i32_0 = arith.constant 0 : i32
    %c0_i32_1 = arith.constant 0 : i32
    return %c0_i32, %c0_i32_0 : i32, i32
  }
  func.func @transform_6(%arg0: i32) -> (i32, i32) {
    %c0_i32 = arith.constant 0 : i32
    %c0_i32_0 = arith.constant 0 : i32
    return %arg0, %c0_i32 : i32, i32
  }
}

</mosaic_0001>

<bundles_post_ra>
// kernel: tpu_custom_call.1
= control target key start
LH: loop header
LB: loop body
LE: loop exit
PB: predicated region body
PF: predicated region fallthrough
CT: control target
= control target key end

     0   :  { %11 = vsyncpa [#allocation3], 0  ;;  %s967_s0 = inlined_call_operand.hbm [shape: f32[8,16], index: 0, kind: input, shape index: {}]   ;;  %s968_s1 = inlined_call_operand.hbm [shape: f32[16,32], index: 1, kind: input, shape index: {}]   ;;  %s969_s2 = inlined_call_operand.hbm [shape: f32[32,128], index: 2, kind: input, shape index: {}]   ;;  %s970_s3 = inlined_call_operand.hbm [shape: f32[128,128], index: 3, kind: input, shape index: {}]   ;;  %s971_s4 = inlined_call_operand.hbm [shape: f32[128,128], index: 4, kind: input, shape index: {}]   ;;  %s972_s5 = inlined_call_operand.vmem [shape: f32[8,128], index: 5, kind: input, shape index: {}]   ;;  %s973_s6 = inlined_call_operand.hbm [shape: f32[8,128], index: 6, kind: output, shape index: {}]  }
   0x1   :  { %12 = vsyncpa [#allocation6], 0 }
   0x2   :  { %13 = vsyncpa [#allocation9], 0 }
   0x3   :  { %14 = vsyncpa [#allocation4], 0  ;;  %s795_s21 = smov [#allocation5]   ;;  %s655_s25 = scalar_lea.hbm %s968_s1, 256 }
   0x4   :  { %s30_s22 = sshll.u32 %s795_s21, 4  ;;  %p656_p0 = scmp.ne.s32.totalorder %s968_s1, %s655_s25  ;;  %s31_s22 = int_to_ptr.vmem [resolvable:$true] %s30_s22 }
   0x5   :  { %p659_p1 = scmp.lt.u32.totalorder %s655_s25, %s968_s1 }
   0x7   :  { %p661_p2 = pnand %p659_p1, %p656_p0 }
   0x9   :  { %664 = shalt.err (!%p661_p2)
}
   0xa   :  { %s665_s30 = scalar_lea.vmem %s31_s22, 256  ;;  %p670_p4 = scmp.lt.s32.totalorder %s31_s22, %s31_s22 }
   0xb   :  { %p666_p3 = scmp.ne.s32.totalorder %s31_s22, %s665_s30  ;;  %p671_p5 = scmp.lt.s32.totalorder %s665_s30, %s665_s30 }
   0xd   :  { %p672_p6 = por %p671_p5, %p670_p4 }
   0xf   :  { %p673_p7 = pnand %p672_p6, %p666_p3 }
  0x11   :  { %676 = shalt.err (!%p673_p7)
}
  0x12   :  { %s796_s7 = smov 128   ;;  %s797_s8 = smov 8  }
  0x13   :  { %36 = dma.hbm_to_vmem [thread:$0]  %s968_s1, 256, %s31_s22, [#allocation6], %s796_s7, %s796_s7, %s797_s8  }
  0x14   :  { %s798_s11 = smov [#allocation8]   ;;  %s799_s13 = smov [#allocation2]  }
  0x15   :  { %s54_s12 = sshll.u32 %s798_s11, 4  ;;  %s21_s14 = sshll.u32 %s799_s13, 4  ;;  %s55_s12 = int_to_ptr.vmem [resolvable:$true] %s54_s12  ;;  %s22_s14 = int_to_ptr.vmem [resolvable:$true] %s21_s14 }
  0x16   :  { %s677_s17 = scalar_lea.hbm %s970_s3, 2048 }
  0x17   :  { %p678_p8 = scmp.ne.s32.totalorder %s970_s3, %s677_s17  ;;  %p681_p9 = scmp.lt.u32.totalorder %s677_s17, %s970_s3 }
  0x19   :  { %p683_p10 = pnand %p681_p9, %p678_p8 }
  0x1b   :  { %686 = shalt.err (!%p683_p10)
}
  0x1c   :  { %s687_s1 = scalar_lea.vmem %s55_s12, 2048  ;;  %p692_p12 = scmp.lt.s32.totalorder %s55_s12, %s55_s12 }
  0x1d   :  { %p688_p11 = scmp.ne.s32.totalorder %s55_s12, %s687_s1  ;;  %p693_p13 = scmp.lt.s32.totalorder %s687_s1, %s687_s1 }
  0x1f   :  { %p694_p0 = por %p693_p13, %p692_p12 }
  0x21   :  { %p695_p1 = pnand %p694_p0, %p688_p11 }
  0x23   :  { %698 = shalt.err (!%p695_p1)
}
  0x24   :  { %60 = dma.hbm_to_vmem [thread:$0]  %s970_s3, 2048, %s55_s12, [#allocation9], %s796_s7, %s796_s7, %s797_s8  }
  0x25   :  { %s699_s26 = scalar_lea.hbm %s967_s0, 128 }
  0x26   :  { %p700_p2 = scmp.ne.s32.totalorder %s967_s0, %s699_s26  ;;  %p703_p3 = scmp.lt.u32.totalorder %s699_s26, %s967_s0 }
  0x28   :  { %p705_p4 = pnand %p703_p3, %p700_p2 }
  0x2a   :  { %708 = shalt.err (!%p705_p4)
}
  0x2b   :  { %s709_s9 = scalar_lea.vmem %s22_s14, 128  ;;  %p714_p6 = scmp.lt.s32.totalorder %s22_s14, %s22_s14 }
  0x2c   :  { %p710_p5 = scmp.ne.s32.totalorder %s22_s14, %s709_s9  ;;  %p715_p7 = scmp.lt.s32.totalorder %s709_s9, %s709_s9 }
  0x2e   :  { %p716_p8 = por %p715_p7, %p714_p6 }
  0x30   :  { %p717_p9 = pnand %p716_p8, %p710_p5 }
  0x32   :  { %720 = shalt.err (!%p717_p9)
}
  0x33   :  { %24 = dma.hbm_to_vmem [thread:$0]  %s967_s0, 128, %s22_s14, [#allocation3]  }
  0x34   :  { %s800_s11 = smov [#allocation7]   ;;  %s801_s13 = smov [#allocation10]  }
  0x35   :  { %s42_s12 = sshll.u32 %s800_s11, 4  ;;  %s66_s15 = sshll.u32 %s801_s13, 4  ;;  %s43_s12 = int_to_ptr.vmem [resolvable:$true] %s42_s12  ;;  %s67_s15 = int_to_ptr.vmem [resolvable:$true] %s66_s15 }
  0x36   :  { %s721_s18 = scalar_lea.hbm %s969_s2, 512 }
  0x37   :  { %p722_p10 = scmp.ne.s32.totalorder %s969_s2, %s721_s18  ;;  %p725_p11 = scmp.lt.u32.totalorder %s721_s18, %s969_s2 }
  0x39   :  { %p727_p12 = pnand %p725_p11, %p722_p10 }
  0x3b   :  { %730 = shalt.err (!%p727_p12)
}
  0x3c   :  { %s731_s0 = scalar_lea.vmem %s43_s12, 512  ;;  %p736_p0 = scmp.lt.s32.totalorder %s43_s12, %s43_s12 }
  0x3d   :  { %p732_p13 = scmp.ne.s32.totalorder %s43_s12, %s731_s0  ;;  %p737_p1 = scmp.lt.s32.totalorder %s731_s0, %s731_s0 }
  0x3f   :  { %p738_p2 = por %p737_p1, %p736_p0 }
  0x41   :  { %p739_p3 = pnand %p738_p2, %p732_p13 }
  0x43   :  { %742 = shalt.err (!%p739_p3)
}
  0x44   :  { %48 = dma.hbm_to_vmem [thread:$0]  %s969_s2, 512, %s43_s12, [#allocation6], %s796_s7, %s796_s7, %s797_s8  }
  0x45   :  { %s743_s25 = scalar_lea.hbm %s971_s4, 2048 }
  0x46   :  { %p744_p4 = scmp.ne.s32.totalorder %s971_s4, %s743_s25  ;;  %p747_p5 = scmp.lt.u32.totalorder %s743_s25, %s971_s4 }
  0x48   :  { %p749_p6 = pnand %p747_p5, %p744_p4 }
  0x4a   :  { %752 = shalt.err (!%p749_p6)
}
  0x4b   :  { %s753_s30 = scalar_lea.vmem %s67_s15, 2048  ;;  %p758_p8 = scmp.lt.s32.totalorder %s67_s15, %s67_s15 }
  0x4c   :  { %p754_p7 = scmp.ne.s32.totalorder %s67_s15, %s753_s30  ;;  %p759_p9 = scmp.lt.s32.totalorder %s753_s30, %s753_s30 }
  0x4e   :  { %p760_p10 = por %p759_p9, %p758_p8 }
  0x50   :  { %p761_p11 = pnand %p760_p10, %p754_p7 }
  0x52   :  { %764 = shalt.err (!%p761_p11)
}
  0x53   :  { %72 = dma.hbm_to_vmem [thread:$0]  %s971_s4, 2048, %s67_s15, [#allocation9], %s796_s7, %s796_s7, %s797_s8  }
  0x54   :  { %787 = dma.done.wait [#allocation3], 128  }
  0x55   :  { %788 = vsyncadd [#allocation3], 4294967168 }
  0x56   :  { %789 = dma.done.wait [#allocation6], 768  }
  0x57   :  { %790 = vsyncadd [#allocation6], 4294966528 }
  0x58   :  { %791 = dma.done.wait [#allocation9], 4096  }
  0x59   :  { %792 = vsyncadd [#allocation9], 4294963200  ;;  %v802_v0 = vmov 0.0|0.0   ;;  %vm803_vm0 = vmmov 0   ;;  %v804_v1 = vmov 0.0   ;;  %v92_v2 = vld [vmem:[#allocation5] sm:$0xff]  ;;  %v94_v33 = vlaneseq }
  0x5a   :  { %587 = vmatprep.subr.bf16.mxu0 %v802_v0  ;;  %503 = vmatprep.mubr.msk.f32.mxu0 %vm803_vm0, %v804_v1  ;;  %v93_v3 = vld [vmem:[#allocation5 + $0x8] sm:$0xff]  ;;  %v173_v5 = vld [vmem:[#allocation7] sm:$0xff]  ;;  %v174_v6 = vld [vmem:[#allocation7 + $0x8] sm:$0xff]  ;;  %vm98_vm1 = vcmask 130048   ;;  %vm181_vm2 = vcmask 261120  }
  0x5b   :  { %590 = vmatprep.subr.bf16.mxu1 %v802_v0  ;;  %514 = vmatprep.mubr.msk.f32.mxu1 %vm803_vm0, %v804_v1  ;;  %v588_v4 = vpack.c.bf16 %v93_v3, %v92_v2  ;;  %v591_v7 = vpack.c.bf16 %v174_v6, %v173_v5  ;;  %v91_v8 = vld [vmem:[#allocation2] sm:$0xff]  ;;  %v175_v9 = vld [vmem:[#allocation7 + $0x10] sm:$0xff]  ;;  %v176_v10 = vld [vmem:[#allocation7 + $0x18] sm:$0xff]  ;;  %v931_v34 = vshrl.u32 %v94_v33, 7 }
  0x5c   :  { %v594_v11 = vpack.c.bf16 %v176_v10, %v175_v9  ;;  %v256_v12 = vld [vmem:[#allocation8] sm:$0xff]  ;;  %v257_v13 = vld [vmem:[#allocation8 + $0x8] sm:$0xff]  ;;  %v258_v14 = vld [vmem:[#allocation8 + $0x10] sm:$0xff] }
  0x5d   :  { %589 = vmatpush3.bf16.msra.mxu0 %v588_v4  ;;  %592 = vmatpush3.bf16.msra.mxu1 %v591_v7  ;;  %v597_v15 = vpack.c.bf16 %v257_v13, %v256_v12  ;;  %v259_v16 = vld [vmem:[#allocation8 + $0x18] sm:$0xff]  ;;  %v260_v18 = vld [vmem:[#allocation8 + $0x20] sm:$0xff]  ;;  %v261_v19 = vld [vmem:[#allocation8 + $0x28] sm:$0xff]  ;;  %v96_v35 = vsub.s32 0, %v931_v34  ;;  %v179_v3 = vsub.s32 1, %v931_v34  ;;  %v274_v12 = vsub.s32 2, %v931_v34 }
  0x5e   :  { %596 = vmatprep.subr.bf16.mxu0 %v802_v0  ;;  %593 = vmatprep.subr.bf16.mxu1 %v802_v0  ;;  %v600_v17 = vpack.c.bf16 %v259_v16, %v258_v14  ;;  %v603_v20 = vpack.c.bf16 %v261_v19, %v260_v18  ;;  %v262_v21 = vld [vmem:[#allocation8 + $0x30] sm:$0xff]  ;;  %v263_v22 = vld [vmem:[#allocation8 + $0x38] sm:$0xff]  ;;  %v264_v24 = vld [vmem:[#allocation8 + $0x40] sm:$0xff] }
  0x5f   :  { %v606_v23 = vpack.c.bf16 %v263_v22, %v262_v21  ;;  %v265_v25 = vld [vmem:[#allocation8 + $0x48] sm:$0xff]  ;;  %v266_v27 = vld [vmem:[#allocation8 + $0x50] sm:$0xff]  ;;  %v267_v28 = vld [vmem:[#allocation8 + $0x58] sm:$0xff] }
  0x60   :  { %504 = vmatmul.mubr.msk.f32.vlgmr.msra.gmra.mrb[0].mxu0 %vm98_vm1, %v91_v8  ;;  %v609_v26 = vpack.c.bf16 %v265_v25, %v264_v24  ;;  %v612_v29 = vpack.c.bf16 %v267_v28, %v266_v27  ;;  %v268_v30 = vld [vmem:[#allocation8 + $0x60] sm:$0xff]  ;;  %v269_v31 = vld [vmem:[#allocation8 + $0x68] sm:$0xff]  ;;  %v270_v42 = vld [vmem:[#allocation8 + $0x70] sm:$0xff] }
  0x61   :  { %549 = vmatprep.mubr.msk.f32.mxu0 %vm803_vm0, %v804_v1  ;;  %595 = vmatpush3.bf16.msra.mxu1 %v594_v11  ;;  %v615_v32 = vpack.c.bf16 %v269_v31, %v268_v30  ;;  %v937_v36 = vld [vmem:[%s972_s5] sm:$0xff]  ;;  %v271_v43 = vld [vmem:[#allocation8 + $0x78] sm:$0xff]  ;;  %v347_v45 = vld [vmem:[#allocation10] sm:$0xff]  ;;  %s805_s5 = smov [#allocation11]  }
  0x62   :  { %620 = vmatprep.subr.bf16.mxu1 %v802_v0  ;;  %598 = vmatpush3.bf16.msra.mxu0 %v597_v15  ;;  %v97_v37 = vrot.slane %v937_v36, %v96_v35  ;;  %v618_v44 = vpack.c.bf16 %v271_v43, %v270_v42  ;;  %v348_v46 = vld [vmem:[#allocation10 + $0x8] sm:$0xff]  ;;  %v349_v47 = vld [vmem:[#allocation10 + $0x10] sm:$0xff]  ;;  %v350_v49 = vld [vmem:[#allocation10 + $0x18] sm:$0xff]  ;;  %v180_v4 = vrot.slane %v937_v36, %v179_v3  ;;  %s444_s8 = sshll.u32 %s805_s5, 4  ;;  %s445_s8 = int_to_ptr.vmem [resolvable:$true] %s444_s8 }
  0x63   :  { %599 = vmatprep.subr.bf16.mxu0 %v802_v0  ;;  %v621_v48 = vpack.c.bf16 %v348_v46, %v347_v45  ;;  %v624_v50 = vpack.c.bf16 %v350_v49, %v349_v47  ;;  %v351_v51 = vld [vmem:[#allocation10 + $0x20] sm:$0xff]  ;;  %v352_v52 = vld [vmem:[#allocation10 + $0x28] sm:$0xff]  ;;  %v353_v54 = vld [vmem:[#allocation10 + $0x30] sm:$0xff]  ;;  %v275_v13 = vrot.slane %v937_v36, %v274_v12  ;;  %s765_s3 = scalar_lea.vmem %s445_s8, 128  ;;  %p770_p13 = scmp.lt.s32.totalorder %s445_s8, %s445_s8 }
  0x64   :  { %v627_v53 = vpack.c.bf16 %v352_v52, %v351_v51  ;;  %v354_v55 = vld [vmem:[#allocation10 + $0x38] sm:$0xff]  ;;  %v355_v57 = vld [vmem:[#allocation10 + $0x40] sm:$0xff]  ;;  %v356_v58 = vld [vmem:[#allocation10 + $0x48] sm:$0xff]  ;;  %p766_p12 = scmp.ne.s32.totalorder %s445_s8, %s765_s3  ;;  %p771_p0 = scmp.lt.s32.totalorder %s765_s3, %s765_s3 }
  0x65   :  { %v630_v56 = vpack.c.bf16 %v354_v55, %v353_v54  ;;  %v633_v59 = vpack.c.bf16 %v356_v58, %v355_v57  ;;  %v357_v60 = vld [vmem:[#allocation10 + $0x50] sm:$0xff]  ;;  %v358_v61 = vld [vmem:[#allocation10 + $0x58] sm:$0xff]  ;;  %v359_v63 = vld [vmem:[#allocation10 + $0x60] sm:$0xff] }
  0x66   :  { %601 = vmatpush3.bf16.msra.mxu0 %v600_v17  ;;  %v636_v62 = vpack.c.bf16 %v358_v61, %v357_v60  ;;  %v361_v9 = vld [vmem:[#allocation10 + $0x70] sm:$0xff]  ;;  %v362_v10 = vld [vmem:[#allocation10 + $0x78] sm:$0xff]  ;;  %v365_v17 = vsub.s32 3, %v931_v34  ;;  %p772_p1 = por %p771_p0, %p770_p13 }
  0x67   :  { %602 = vmatprep.subr.bf16.mxu0 %v802_v0  ;;  %v642_v11 = vpack.c.bf16 %v362_v10, %v361_v9 }
  0x68   :  { %v366_v18 = vrot.slane %v937_v36, %v365_v17  ;;  %p773_p2 = pnand %p772_p1, %p766_p12 }
  0x6a   :  { %604 = vmatpush3.bf16.msra.mxu0 %v603_v20 }
  0x6b   :  { %605 = vmatprep.subr.bf16.mxu0 %v802_v0 }
  0x6e   :  { %607 = vmatpush3.bf16.msra.mxu0 %v606_v23 }
  0x6f   :  { %608 = vmatprep.subr.bf16.mxu0 %v802_v0 }
  0x72   :  { %610 = vmatpush3.bf16.msra.mxu0 %v609_v26 }
  0x73   :  { %611 = vmatprep.subr.bf16.mxu0 %v802_v0 }
  0x76   :  { %613 = vmatpush3.bf16.msra.mxu0 %v612_v29 }
  0x77   :  { %614 = vmatprep.subr.bf16.mxu0 %v802_v0 }
  0x7a   :  { %616 = vmatpush3.bf16.msra.mxu0 %v615_v32 }
  0x7b   :  { %617 = vmatprep.subr.bf16.mxu0 %v802_v0 }
  0x7e   :  { %619 = vmatpush3.bf16.msra.mxu0 %v618_v44 }
 0x133   :  { %v168_v38 = vpop.f32.mrb[0].mxu0 }
 0x134   :  { %v169_v39 = vadd.f32 %v168_v38, %v97_v37  ;;  %v505_v40 = vpop.f32.mrb[1].mxu0 }
 0x136   :  { %v172_v41 = vmax.f32 %v169_v39, 0.0 }
 0x138   :  { %515 = vmatmul.mubr.msk.f32.vlgmr.msra.gmra.mrb[0].mxu1 %vm181_vm2, %v172_v41 }
 0x139   :  { %584 = vmatprep.mubr.msk.f32.mxu1 %vm803_vm0, %v804_v1  ;;  %622 = vmatpush3.bf16.msra.mxu1 %v621_v48  ;;  %v360_v1 = vld [vmem:[#allocation10 + $0x68] sm:$0xff] }
 0x13a   :  { %623 = vmatprep.subr.bf16.mxu1 %v802_v0  ;;  %v639_v2 = vpack.c.bf16 %v360_v1, %v359_v63 }
 0x13d   :  { %625 = vmatpush3.bf16.msra.mxu1 %v624_v50 }
 0x13e   :  { %626 = vmatprep.subr.bf16.mxu1 %v802_v0 }
 0x141   :  { %628 = vmatpush3.bf16.msra.mxu1 %v627_v53 }
 0x142   :  { %629 = vmatprep.subr.bf16.mxu1 %v802_v0 }
 0x145   :  { %631 = vmatpush3.bf16.msra.mxu1 %v630_v56 }
 0x146   :  { %632 = vmatprep.subr.bf16.mxu1 %v802_v0 }
 0x149   :  { %634 = vmatpush3.bf16.msra.mxu1 %v633_v59 }
 0x14a   :  { %635 = vmatprep.subr.bf16.mxu1 %v802_v0 }
 0x14d   :  { %637 = vmatpush3.bf16.msra.mxu1 %v636_v62 }
 0x14e   :  { %638 = vmatprep.subr.bf16.mxu1 %v802_v0 }
 0x151   :  { %640 = vmatpush3.bf16.msra.mxu1 %v639_v2 }
 0x152   :  { %641 = vmatprep.subr.bf16.mxu1 %v802_v0 }
 0x155   :  { %643 = vmatpush3.bf16.msra.mxu1 %v642_v11 }
 0x20b   :  { %v251_v5 = vpop.f32.mrb[0].mxu1 }
 0x20c   :  { %v252_v6 = vadd.f32 %v251_v5, %v180_v4  ;;  %v516_v7 = vpop.f32.mrb[1].mxu1 }
 0x20e   :  { %v255_v8 = vmax.f32 %v252_v6, 0.0 }
 0x210   :  { %550 = vmatmul.mubr.f32.vlgmr.msra.gmra.mrb[2].mxu0 %v255_v8 }
 0x2e3   :  { %v342_v14 = vpop.f32.mrb[2].mxu0 }
 0x2e4   :  { %v343_v15 = vadd.f32 %v342_v14, %v275_v13  ;;  %v551_v0 = vpop.f32.mrb[3].mxu0 }
 0x2e6   :  { %v346_v16 = vmax.f32 %v343_v15, 0.0 }
 0x2e8   :  { %585 = vmatmul.mubr.f32.vlgmr.msra.gmra.mrb[2].mxu1 %v346_v16 }
 0x3bb   :  { %v433_v19 = vpop.f32.mrb[2].mxu1 }
 0x3bc   :  { %v434_v20 = vadd.f32 %v433_v19, %v366_v18  ;;  %v586_v21 = vpop.f32.mrb[3].mxu1 }
 0x3be   :  { %437 = vst [vmem:[#allocation11] sm:$0xff] %v434_v20 }
 0x3bf   :  { %776 = shalt.err (!%p773_p2)
}
 0x3c0   :  { %s777_s12 = scalar_lea.hbm %s973_s6, 128 }
 0x3c1   :  { %p778_p3 = scmp.ne.s32.totalorder %s973_s6, %s777_s12  ;;  %p781_p4 = scmp.lt.u32.totalorder %s777_s12, %s973_s6 }
 0x3c3   :  { %p783_p5 = pnand %p781_p4, %p778_p3 }
 0x3c5   :  { %786 = shalt.err (!%p783_p5)
}
 0x3c6   :  { %447 = dma.vmem_to_hbm [thread:$0]  %s445_s8, 128, %s973_s6, [#allocation4]  }
 0x3c7   :  { %793 = dma.done.wait [#allocation4], 128  }
 0x3c8   :  { %794 = vsyncadd [#allocation4], 4294967168 }
 0x3c9   :  { %451 = vsyncpa [#allocation3], 1 }
 0x3ca   :  { %452 = vsyncpa [#allocation6], 1 }
 0x3cb   :  { %453 = vsyncpa [#allocation9], 1 }
 0x3cc   :  { %454 = vsyncpa [#allocation4], 1 }

</bundles_post_ra>
